<compile_context>
chip_gen: v7x
topology: tpu7x:2x2x1
jax: 0.10.0
libtpu: 0.0.40
codegen_flags: <defaults>
</compile_context>

<pallas_src>
import functools
import math

import jax
import jax.numpy as jnp
from jax.experimental import pallas as pl
from jax.experimental.pallas import tpu as pltpu


def _flattened_shape(shape, start_dim, end_dim):
    ndim = len(shape)
    if end_dim == -1 or end_dim == ndim:
        return tuple(shape[:start_dim]) + (math.prod(shape[start_dim:]),)
    return (
        tuple(shape[:start_dim])
        + (math.prod(shape[start_dim : end_dim + 1]),)
        + tuple(shape[end_dim + 1 :])
    )


def _choose_slab(n_elems):
    """Pick a lane-dense 2D slab (rows, cols) and a small DMA chunk count.

    cols is the largest of {4096, ..., 128} dividing n_elems; otherwise the
    slab is (1, n).  The chunk count (1, 2 or 4) is chosen so each chunk's row
    extent is a multiple of 8 — every DMA slice stays (8,128)-tile aligned.
    """
    rows, cols = 1, n_elems
    for c in (4096, 2048, 1024, 512, 256, 128):
        if n_elems % c == 0:
            rows, cols = n_elems // c, c
            break
    nchunks = 1
    for cand in (4, 2):
        if rows % cand == 0 and (rows // cand) % 8 == 0:
            nchunks = cand
            break
    return rows, cols, nchunks, rows // nchunks


def _dma_copy_kernel(x_hbm, o_hbm, sems, *, nchunks, block_rows):
    # Direct HBM->HBM copy: issue every chunk's DMA first (they run
    # concurrently on the DMA engines), then wait on all of them.
    for c in range(nchunks):
        pltpu.make_async_copy(
            x_hbm.at[pl.ds(c * block_rows, block_rows), :],
            o_hbm.at[pl.ds(c * block_rows, block_rows), :],
            sems.at[c],
        ).start()
    for c in range(nchunks):
        pltpu.make_async_copy(
            x_hbm.at[pl.ds(c * block_rows, block_rows), :],
            o_hbm.at[pl.ds(c * block_rows, block_rows), :],
            sems.at[c],
        ).wait()


def pallas_flatten(x, start_dim: int = 1, end_dim: int = -1, *, materialize: bool = False):
    """Flatten dims [start_dim, end_dim] (inclusive), matching the PyTorch module.

    Default: metadata-only reshape (optimal — Flatten of a contiguous tensor is
    free).  materialize=True forces a fresh buffer via a direct HBM->HBM DMA
    Pallas kernel.
    """
    out_shape = _flattened_shape(x.shape, start_dim, end_dim)
    if not materialize:
        return jnp.reshape(x, out_shape)

    n = math.prod(x.shape) if x.ndim > 0 else 1
    rows, cols, nchunks, block_rows = _choose_slab(n)
    # Metadata-only lane-dense view of the same contiguous row-major buffer.
    x2d = jnp.reshape(x, (rows, cols))

    y2d = pl.pallas_call(
        functools.partial(_dma_copy_kernel, nchunks=nchunks, block_rows=block_rows),
        out_shape=jax.ShapeDtypeStruct((rows, cols), x.dtype),
        in_specs=[pl.BlockSpec(memory_space=pl.ANY)],
        out_specs=pl.BlockSpec(memory_space=pl.ANY),
        scratch_shapes=[pltpu.SemaphoreType.DMA((nchunks,))],
    )(x2d)

    return jnp.reshape(y2d, out_shape)


if __name__ == "__main__":
    key = jax.random.PRNGKey(0)

    # NCHW input, like the PyTorch module would see from a conv stack.
    x = jax.random.normal(key, (2, 4, 16, 16), dtype=jnp.float32)

    # Default Flatten(start_dim=1, end_dim=-1): metadata-only path.
    y = pallas_flatten(x, start_dim=1, end_dim=-1)
    jax.block_until_ready(y)
    assert y.shape == (2, 1024), y.shape
    assert y.dtype == x.dtype
    assert bool(jnp.array_equal(y, jnp.reshape(x, (2, 1024))))

    # Non-default end_dim: flatten dims 1..2 -> (2, 64, 16).
    y2 = pallas_flatten(x, start_dim=1, end_dim=2)
    jax.block_until_ready(y2)
    assert y2.shape == (2, 64, 16), y2.shape
    assert bool(jnp.array_equal(y2, jnp.reshape(x, (2, 64, 16))))

    # Materializing Pallas path: single whole-slab HBM->HBM DMA (rows=1, cols=2048).
    ym = pallas_flatten(x, start_dim=1, end_dim=-1, materialize=True)
    jax.block_until_ready(ym)
    assert ym.shape == (2, 1024), ym.shape
    assert bool(jnp.array_equal(ym, jnp.reshape(x, (2, 1024))))

    # Multi-chunk DMA path: (4,8,32,128) -> slab (32, 4096), 4 tile-aligned chunks.
    x3 = jax.random.normal(key, (4, 8, 32, 128), dtype=jnp.float32)
    y3 = pallas_flatten(x3, start_dim=1, end_dim=-1, materialize=True)
    jax.block_until_ready(y3)
    assert y3.shape == (4, 8 * 32 * 128), y3.shape
    assert bool(jnp.array_equal(y3, jnp.reshape(x3, (4, 8 * 32 * 128))))

    # Awkward non-128-divisible element count -> single whole-array DMA.
    x4 = jax.random.normal(key, (2, 3, 5, 7), dtype=jnp.float32)
    y4 = pallas_flatten(x4, start_dim=1, end_dim=-1, materialize=True)
    jax.block_until_ready(y4)
    assert y4.shape == (2, 105), y4.shape
    assert bool(jnp.array_equal(y4, jnp.reshape(x4, (2, 105))))

    print("KERNEL_OK")
</pallas_src>

<mosaic_0001>
module attributes {stable_mosaic.version = 11 : i64} {
  func.func @_dma_copy_kernel(%arg0: memref<1x2048xf32, #tpu.memory_space<any>>, %arg1: memref<1x2048xf32, #tpu.memory_space<any>>, %arg2: memref<1x!tpu.dma_semaphore, #tpu.memory_space<semaphore_mem>>) attributes {dimension_semantics = [], scalar_prefetch = 0 : i64, scratch_operands = 1 : i64, tpu.core_type = #tpu.core_type<tc>} {
    %c0_i32 = arith.constant 0 : i32
    %c0_i32_0 = arith.constant 0 : i32
    %c0_i32_1 = arith.constant 0 : i32
    %0 = tpu.memref_slice %arg0[%c0_i32_0, %c0_i32_1] : memref<1x2048xf32, #tpu.memory_space<any>> -> memref<1x2048xf32, #tpu.memory_space<any>>
    %c0_i32_2 = arith.constant 0 : i32
    %c0_i32_3 = arith.constant 0 : i32
    %1 = tpu.memref_slice %arg1[%c0_i32_2, %c0_i32_3] : memref<1x2048xf32, #tpu.memory_space<any>> -> memref<1x2048xf32, #tpu.memory_space<any>>
    %2 = tpu.memref_slice %arg2[%c0_i32] : memref<1x!tpu.dma_semaphore, #tpu.memory_space<semaphore_mem>> -> memref<1x!tpu.dma_semaphore, #tpu.memory_space<semaphore_mem>>
    %3 = tpu.memref_squeeze %2 : memref<1x!tpu.dma_semaphore, #tpu.memory_space<semaphore_mem>> -> memref<!tpu.dma_semaphore, #tpu.memory_space<semaphore_mem>>
    tpu.enqueue_dma source(%0 : memref<1x2048xf32, #tpu.memory_space<any>>) target(%1 : memref<1x2048xf32, #tpu.memory_space<any>>) target_semaphore(%3 : memref<!tpu.dma_semaphore, #tpu.memory_space<semaphore_mem>>)
    %c0_i32_4 = arith.constant 0 : i32
    %c0_i32_5 = arith.constant 0 : i32
    %c0_i32_6 = arith.constant 0 : i32
    %4 = tpu.memref_slice %arg0[%c0_i32_5, %c0_i32_6] : memref<1x2048xf32, #tpu.memory_space<any>> -> memref<1x2048xf32, #tpu.memory_space<any>>
    %c0_i32_7 = arith.constant 0 : i32
    %c0_i32_8 = arith.constant 0 : i32
    %5 = tpu.memref_slice %arg1[%c0_i32_7, %c0_i32_8] : memref<1x2048xf32, #tpu.memory_space<any>> -> memref<1x2048xf32, #tpu.memory_space<any>>
    %6 = tpu.memref_slice %arg2[%c0_i32_4] : memref<1x!tpu.dma_semaphore, #tpu.memory_space<semaphore_mem>> -> memref<1x!tpu.dma_semaphore, #tpu.memory_space<semaphore_mem>>
    %7 = tpu.memref_squeeze %6 : memref<1x!tpu.dma_semaphore, #tpu.memory_space<semaphore_mem>> -> memref<!tpu.dma_semaphore, #tpu.memory_space<semaphore_mem>>
    tpu.wait_dma2 semaphore(%7 : memref<!tpu.dma_semaphore, #tpu.memory_space<semaphore_mem>>) src(%4 : memref<1x2048xf32, #tpu.memory_space<any>>) dst(%5 : memref<1x2048xf32, #tpu.memory_space<any>>)
    return
  }
}

</mosaic_0001>

<bundles_post_ra>
// kernel: tpu_custom_call.1
= control target key start
LH: loop header
LB: loop body
LE: loop exit
PB: predicated region body
PF: predicated region fallthrough
CT: control target
= control target key end

     0   :  { %s34_s6 = smov [#allocation2]   ;;  %s35_s7 = smov [#allocation3]   ;;  %s53_s0 = inlined_call_operand.hbm [shape: f32[1,2048], index: 0, kind: input, shape index: {}]   ;;  %s54_s1 = inlined_call_operand.hbm [shape: f32[1,2048], index: 1, kind: output, shape index: {}]  }
   0x1   :  { %s36_s8 = smov 0  }
   0x2   :  { %18 = dma.general %s53_s0, 256, %s54_s1, %s34_s6, %s35_s7, [#allocation4], %s36_s8, 0  }
   0x3   :  { %32 = dma.done.wait [#allocation2], 256 }
   0x4   :  { %33 = vsyncadd [#allocation2], 4294967040 }
   0x5   :  { %22 = vsyncmov [#allocation2] }
   0x8   :  { %s23_s13 = vpop.sfrf %22 }
   0x9   :  { %p28_p0 = scmp.ne.s32.totalorder %s23_s13, 0 }
   0xb   :  { %27 = shalt.err (%p28_p0)  }

</bundles_post_ra>
